<compile_context>
chip_gen: v7x
topology: tpu7x:2x2x1
jax: 0.10.0
libtpu: 0.0.40
codegen_flags: <defaults>
</compile_context>

<pallas_src>
import functools
import numpy as np
import jax
import jax.numpy as jnp
from jax.experimental import pallas as pl
from jax.experimental.pallas import tpu as pltpu


_VMEM_LIMIT = 32 * 1024 * 1024      # fits v5e/v6e/v7x scoped budgets
_TM_CAP = 256                       # M/N tiles up to 256 (matches v6e/v7x 2x256 MXU)
_TN_CAP = 256
_TK_CAP = 1024                      # big K tiles -> fewer grid steps on deep convs


def _round_up(x, m):
    return -(-x // m) * m


def _pick_tile_mn(dim, cap):
    return min(cap, _round_up(dim, 128))


def _pick_tile_k(k, cap=_TK_CAP):
    """Multiple-of-128 K tile <= cap minimizing padded K (floor 256 to limit k-steps)."""
    r = _round_up(k, 128)
    if r <= cap:
        return r
    best_t, best_p = cap, _round_up(r, cap)
    t = cap - 128
    while t >= 256:
        p = _round_up(r, t)
        if p < best_p:
            best_t, best_p = t, p
        t -= 128
    return best_t


def _cparams(sem):
    return pltpu.CompilerParams(dimension_semantics=sem,
                                vmem_limit_bytes=_VMEM_LIMIT)


# ----------------------------- MXU matmul kernels ----------------------------
def _matmul_kernel(a_ref, b_ref, o_ref, acc_ref):
    @pl.when(pl.program_id(2) == 0)
    def _():
        acc_ref[...] = jnp.zeros_like(acc_ref)

    acc_ref[...] += jnp.dot(a_ref[...], b_ref[...],
                            preferred_element_type=jnp.float32)

    @pl.when(pl.program_id(2) == pl.num_programs(2) - 1)
    def _():
        o_ref[...] = acc_ref[...].astype(o_ref.dtype)


def _matmul_attn_kernel(a_ref, b_ref, bd_ref, aw_ref, ab_ref, o_ref, acc_ref):
    """Matmul + fused deconv bias + attention gate (x * sigmoid(conv1x1(x))).

    Grid is (phase, m, k); the phase dim of a/b/o is squeezed away by BlockSpec.
    """
    @pl.when(pl.program_id(2) == 0)
    def _():
        acc_ref[...] = jnp.zeros_like(acc_ref)

    acc_ref[...] += jnp.dot(a_ref[...], b_ref[...],
                            preferred_element_type=jnp.float32)

    @pl.when(pl.program_id(2) == pl.num_programs(2) - 1)
    def _():
        f = acc_ref[...] + bd_ref[...]                    # deconv bias
        logits = jnp.sum(f * aw_ref[...], axis=-1, keepdims=True) + ab_ref[...]
        o_ref[...] = f * jax.nn.sigmoid(logits)           # gate (XLU reduce + EUP)


def _matmul_heads_kernel(a_ref, b_ref, bias_ref, o_ref, acc_ref):
    """Matmul + fused heads: lane0=depth, lane1=exp(unc), lanes2..4=L2-normalized."""
    @pl.when(pl.program_id(1) == 0)
    def _():
        acc_ref[...] = jnp.zeros_like(acc_ref)

    acc_ref[...] += jnp.dot(a_ref[...], b_ref[...],
                            preferred_element_type=jnp.float32)

    @pl.when(pl.program_id(1) == pl.num_programs(1) - 1)
    def _():
        f = acc_ref[...] + bias_ref[...]
        lane = jax.lax.broadcasted_iota(jnp.int32, f.shape, 1)
        is_n = jnp.logical_and(lane >= 2, lane < 5)
        nsq = jnp.where(is_n, f * f, 0.0)
        norm = jnp.sqrt(jnp.sum(nsq, axis=-1, keepdims=True))
        n_hat = f / jnp.maximum(norm, 1e-12)              # F.normalize semantics
        out = jnp.where(lane == 0, f,
              jnp.where(lane == 1, jnp.exp(f),
              jnp.where(is_n, n_hat, 0.0)))
        o_ref[...] = out                                   # lane-dense (tm,128) store


def _mm_plain(a, b, tm, tn, tk):
    Mp, Kp = a.shape
    Np = b.shape[1]
    return pl.pallas_call(
        _matmul_kernel,
        out_shape=jax.ShapeDtypeStruct((Mp, Np), jnp.float32),
        grid_spec=pltpu.PrefetchScalarGridSpec(
            num_scalar_prefetch=0,
            grid=(Mp // tm, Np // tn, Kp // tk),
            in_specs=[pl.BlockSpec((tm, tk), lambda i, j, k: (i, k)),
                      pl.BlockSpec((tk, tn), lambda i, j, k: (k, j))],
            out_specs=pl.BlockSpec((tm, tn), lambda i, j, k: (i, j)),
            scratch_shapes=[pltpu.VMEM((tm, tn), jnp.float32)]),
        compiler_params=_cparams(("parallel", "parallel", "arbitrary")),
    )(a, b)


def _mm_attn(a, b, bd, aw, ab, tm, tk):
    """Batched over 4 sub-pixel phases: a (4,Mp,Kp) bf16, b (4,Kp,Np) bf16."""
    P, Mp, Kp = a.shape
    Np = b.shape[2]                                        # single N tile
    return pl.pallas_call(
        _matmul_attn_kernel,
        out_shape=jax.ShapeDtypeStruct((P, Mp, Np), jnp.float32),
        grid_spec=pltpu.PrefetchScalarGridSpec(
            num_scalar_prefetch=0,
            grid=(P, Mp // tm, Kp // tk),
            in_specs=[pl.BlockSpec((None, tm, tk), lambda p, i, k: (p, i, k)),
                      pl.BlockSpec((None, tk, Np), lambda p, i, k: (p, k, 0)),
                      pl.BlockSpec((1, Np), lambda p, i, k: (0, 0)),
                      pl.BlockSpec((1, Np), lambda p, i, k: (0, 0)),
                      pl.BlockSpec((1, 1), lambda p, i, k: (0, 0))],
            out_specs=pl.BlockSpec((None, tm, Np), lambda p, i, k: (p, i, 0)),
            scratch_shapes=[pltpu.VMEM((tm, Np), jnp.float32)]),
        compiler_params=_cparams(("parallel", "parallel", "arbitrary")),
    )(a, b, bd, aw, ab)


def _mm_heads(a, b, bias, tm, tk):
    Mp, Kp = a.shape
    Np = b.shape[1]                                        # 128 (single tile)
    return pl.pallas_call(
        _matmul_heads_kernel,
        out_shape=jax.ShapeDtypeStruct((Mp, Np), jnp.float32),
        grid_spec=pltpu.PrefetchScalarGridSpec(
            num_scalar_prefetch=0,
            grid=(Mp // tm, Kp // tk),
            in_specs=[pl.BlockSpec((tm, tk), lambda i, k: (i, k)),
                      pl.BlockSpec((tk, Np), lambda i, k: (k, 0)),
                      pl.BlockSpec((1, Np), lambda i, k: (0, 0))],
            out_specs=pl.BlockSpec((tm, Np), lambda i, k: (i, 0)),
            scratch_shapes=[pltpu.VMEM((tm, Np), jnp.float32)]),
        compiler_params=_cparams(("parallel", "arbitrary")),
    )(a, b, bias)


# ------------------- BatchNorm (two-pass, gridded over M) --------------------
def _bn_stats_kernel(x_ref, sum_ref, ssq_ref):
    @pl.when(pl.program_id(0) == 0)
    def _():
        sum_ref[...] = jnp.zeros_like(sum_ref)
        ssq_ref[...] = jnp.zeros_like(ssq_ref)
    x = x_ref[...]
    sum_ref[...] += jnp.sum(x, axis=0, keepdims=True)
    ssq_ref[...] += jnp.sum(x * x, axis=0, keepdims=True)


def _bn_apply_kernel(x_ref, s_ref, ss_ref, g_ref, b_ref, o_ref, *, count, relu):
    mean = s_ref[...] * (1.0 / count)
    var = jnp.maximum(ss_ref[...] * (1.0 / count) - mean * mean, 0.0)
    scale = g_ref[...] * jax.lax.rsqrt(var + 1e-5)
    shift = b_ref[...] - mean * scale
    y = x_ref[...] * scale + shift
    if relu:
        y = jnp.maximum(y, 0.0)
    o_ref[...] = y


def _bn_res_apply_kernel(x_ref, s_ref, ss_ref, g_ref, b_ref, r_ref, o_ref, *, count):
    mean = s_ref[...] * (1.0 / count)
    var = jnp.maximum(ss_ref[...] * (1.0 / count) - mean * mean, 0.0)
    scale = g_ref[...] * jax.lax.rsqrt(var + 1e-5)
    shift = b_ref[...] - mean * scale
    o_ref[...] = jnp.maximum(x_ref[...] * scale + shift + r_ref[...], 0.0)


def _bn_row_tile(M, C):
    # keep each (rows, C) f32 tile around <= 2 MiB so in/out double-buffers fit VMEM
    cap = max(256, min(1024, ((2 << 20) // (4 * C)) // 8 * 8))
    return min(cap, _round_up(M, 8))


def _bn_stats(xp, tmr):
    Mp, C = xp.shape
    return pl.pallas_call(
        _bn_stats_kernel,
        out_shape=(jax.ShapeDtypeStruct((1, C), jnp.float32),
                   jax.ShapeDtypeStruct((1, C), jnp.float32)),
        grid_spec=pltpu.PrefetchScalarGridSpec(
            num_scalar_prefetch=0,
            grid=(Mp // tmr,),
            in_specs=[pl.BlockSpec((tmr, C), lambda i: (i, 0))],
            out_specs=(pl.BlockSpec((1, C), lambda i: (0, 0)),
                       pl.BlockSpec((1, C), lambda i: (0, 0)))),
        compiler_params=_cparams(("arbitrary",)),
    )(xp)


@functools.partial(jax.jit, static_argnames=("relu",))
def _bn_forward(x2, gamma, beta, relu):
    M, C = x2.shape
    tmr = _bn_row_tile(M, C)
    Mp = _round_up(M, tmr)
    xp = jnp.pad(x2, ((0, Mp - M), (0, 0)))                # zero rows: stats-safe
    s, ss = _bn_stats(xp, tmr)
    y = pl.pallas_call(
        functools.partial(_bn_apply_kernel, count=float(M), relu=relu),
        out_shape=jax.ShapeDtypeStruct((Mp, C), jnp.float32),
        grid_spec=pltpu.PrefetchScalarGridSpec(
            num_scalar_prefetch=0,
            grid=(Mp // tmr,),
            in_specs=[pl.BlockSpec((tmr, C), lambda i: (i, 0)),
                      pl.BlockSpec((1, C), lambda i: (0, 0)),
                      pl.BlockSpec((1, C), lambda i: (0, 0)),
                      pl.BlockSpec((1, C), lambda i: (0, 0)),
                      pl.BlockSpec((1, C), lambda i: (0, 0))],
            out_specs=pl.BlockSpec((tmr, C), lambda i: (i, 0))),
        compiler_params=_cparams(("parallel",)),
    )(xp, s, ss, gamma, beta)
    return y[:M]


@jax.jit
def _bn_res_forward(x2, gamma, beta, res2):
    M, C = x2.shape
    tmr = _bn_row_tile(M, C)
    Mp = _round_up(M, tmr)
    pad = ((0, Mp - M), (0, 0))
    xp = jnp.pad(x2, pad)
    rp = jnp.pad(res2, pad)
    s, ss = _bn_stats(xp, tmr)
    y = pl.pallas_call(
        functools.partial(_bn_res_apply_kernel, count=float(M)),
        out_shape=jax.ShapeDtypeStruct((Mp, C), jnp.float32),
        grid_spec=pltpu.PrefetchScalarGridSpec(
            num_scalar_prefetch=0,
            grid=(Mp // tmr,),
            in_specs=[pl.BlockSpec((tmr, C), lambda i: (i, 0)),
                      pl.BlockSpec((1, C), lambda i: (0, 0)),
                      pl.BlockSpec((1, C), lambda i: (0, 0)),
                      pl.BlockSpec((1, C), lambda i: (0, 0)),
                      pl.BlockSpec((1, C), lambda i: (0, 0)),
                      pl.BlockSpec((tmr, C), lambda i: (i, 0))],
            out_specs=pl.BlockSpec((tmr, C), lambda i: (i, 0))),
        compiler_params=_cparams(("parallel",)),
    )(xp, s, ss, gamma, beta, rp)
    return y[:M]


def batchnorm(x, bnp, relu=False, residual=None):
    N, H, W, C = x.shape
    x2 = x.reshape(-1, C)
    if residual is not None:
        y = _bn_res_forward(x2, bnp["gamma"], bnp["beta"], residual.reshape(-1, C))
    else:
        y = _bn_forward(x2, bnp["gamma"], bnp["beta"], relu=relu)
    return y.reshape(N, H, W, C)


# --------------------------------- maxpool -----------------------------------
@jax.jit
def _maxpool_3x3_s2_p1(x):
    # plain-JAX max tree (no 9x patch materialization through a Pallas slab)
    N, H, W, C = x.shape
    xp = jnp.pad(x, ((0, 0), (1, 1), (1, 1), (0, 0)), constant_values=-jnp.inf)
    Ho = (H + 2 - 3) // 2 + 1
    Wo = (W + 2 - 3) // 2 + 1
    out = None
    for kh in range(3):
        for kw in range(3):
            s = xp[:, kh:kh + Ho * 2:2, kw:kw + Wo * 2:2, :]
            out = s if out is None else jnp.maximum(out, s)
    return out


# ----------------------------- conv glue (im2col) ----------------------------
def _im2col(x, kh, kw, stride, padding):
    N, H, W, Cin = x.shape
    if padding:
        x = jnp.pad(x, ((0, 0), (padding, padding), (padding, padding), (0, 0)))
    Hp, Wp = H + 2 * padding, W + 2 * padding
    Ho = (Hp - kh) // stride + 1
    Wo = (Wp - kw) // stride + 1
    if kh == 1 and kw == 1 and stride == 1:
        return x.reshape(N * Ho * Wo, Cin), N, Ho, Wo
    cols = [x[:, i:i + Ho * stride:stride, j:j + Wo * stride:stride, :]
            for i in range(kh) for j in range(kw)]
    patches = jnp.concatenate(cols, axis=-1).reshape(N * Ho * Wo, kh * kw * Cin)
    return patches, N, Ho, Wo


@functools.partial(jax.jit,
                   static_argnames=("stride", "padding", "kh", "kw", "cout", "tn", "tk"))
def _conv2d_jit(x, w, stride, padding, kh, kw, cout, tn, tk):
    # cast BEFORE im2col so the materialized patch slab is half-width (bf16)
    patches, N, Ho, Wo = _im2col(x.astype(jnp.bfloat16), kh, kw, stride, padding)
    M, K = patches.shape
    Kp, Np = w.shape
    tm = _pick_tile_mn(M, _TM_CAP)
    Mp = _round_up(M, tm)
    a = jnp.pad(patches, ((0, Mp - M), (0, Kp - K)))
    out = _mm_plain(a, w, tm, tn, tk)
    return out[:M, :cout].reshape(N, Ho, Wo, cout)


def conv2d(x, wp, stride=1, padding=0):
    return _conv2d_jit(x, wp["w"], stride=stride, padding=padding,
                       kh=wp["kh"], kw=wp["kw"], cout=wp["cout"],
                       tn=wp["tn"], tk=wp["tk"])


# ------ ConvTranspose2d(4,2,1) via sub-pixel phases + fused attention gate ----
@functools.partial(jax.jit, static_argnames=("cout", "tk"))
def _deconv_attn_stage(x, w_phases, b_dec, att_w, att_b, cout, tk):
    N, H, W, Cin = x.shape
    M = N * H * W
    K = 4 * Cin
    Kp = w_phases.shape[1]
    tm = _pick_tile_mn(M, _TM_CAP)
    Mp = _round_up(M, tm)
    xb = x.astype(jnp.bfloat16)
    phase_patches = []
    for (pa, pb) in ((0, 0), (0, 1), (1, 0), (1, 1)):
        xp = jnp.pad(xb, ((0, 0), (1 - pa, pa), (1 - pb, pb), (0, 0)))
        cols = [xp[:, dr:dr + H, dc:dc + W, :] for dr in range(2) for dc in range(2)]
        patches = jnp.concatenate(cols, axis=-1).reshape(M, K)
        phase_patches.append(jnp.pad(patches, ((0, Mp - M), (0, Kp - K))))
    a = jnp.stack(phase_patches)                           # (4, Mp, Kp) bf16
    out = _mm_attn(a, w_phases, b_dec, att_w, att_b, tm, tk)   # (4, Mp, Np)
    ph = out[:, :M, :cout].reshape(4, N, H, W, cout)
    st = jnp.transpose(ph, (1, 2, 3, 0, 4)).reshape(N, H, W, 2, 2, cout)
    return jnp.transpose(st, (0, 1, 3, 2, 4, 5)).reshape(N, 2 * H, 2 * W, cout)


# ---------------------------- fused heads forward ----------------------------
@functools.partial(jax.jit, static_argnames=("tk",))
def _heads_forward(x, w, bias, tk):
    N, H, W, _ = x.shape
    patches, _, Ho, Wo = _im2col(x.astype(jnp.bfloat16), 3, 3, 1, 1)
    M, K = patches.shape
    Kp, _ = w.shape
    tm = _pick_tile_mn(M, _TM_CAP)
    Mp = _round_up(M, tm)
    a = jnp.pad(patches, ((0, Mp - M), (0, Kp - K)))
    out = _mm_heads(a, w, bias, tm, tk)[:M]                # (M, 128) lane-dense
    depth = out[:, 0:1].reshape(N, Ho, Wo, 1)
    unc = out[:, 1:2].reshape(N, Ho, Wo, 1)
    nrm = out[:, 2:5].reshape(N, Ho, Wo, 3)
    to_nchw = lambda t: jnp.transpose(t, (0, 3, 1, 2))
    return to_nchw(depth), to_nchw(unc), to_nchw(nrm)


# ------------------------------- parameters ----------------------------------
class ParamGen:
    def __init__(self, seed):
        self._key = jax.random.PRNGKey(seed)
        self._n = 0

    def _next(self):
        self._n += 1
        return jax.random.fold_in(self._key, self._n)

    def conv(self, kh, kw, cin, cout):
        std = 1.0 / np.sqrt(kh * kw * cin)
        return jax.random.normal(self._next(), (kh, kw, cin, cout), jnp.float32) * std

    def bias(self, c):
        return jax.random.normal(self._next(), (1, c), jnp.float32) * 0.01

    def bn(self, c):
        return {"gamma": jnp.ones((1, c), jnp.float32),
                "beta": jnp.zeros((1, c), jnp.float32)}


def make_bottleneck(pg, inplanes, planes, stride, downsample):
    p = {"stride": stride,
         "conv1": pg.conv(1, 1, inplanes, planes), "bn1": pg.bn(planes),
         "conv2": pg.conv(3, 3, planes, planes), "bn2": pg.bn(planes),
         "conv3": pg.conv(1, 1, planes, planes * 4), "bn3": pg.bn(planes * 4)}
    if downsample:
        p["down_conv"] = pg.conv(1, 1, inplanes, planes * 4)
        p["down_bn"] = pg.bn(planes * 4)
    return p


def make_params(seed=0):
    pg = ParamGen(seed)
    params = {"conv1": pg.conv(7, 7, 3, 64), "bn1": pg.bn(64)}
    layers, inplanes = [], 64
    for planes, blocks, stride in ((64, 3, 1), (128, 4, 2), (256, 6, 2), (512, 3, 2)):
        layer = [make_bottleneck(pg, inplanes, planes, stride, True)]
        inplanes = planes * 4
        for _ in range(blocks - 1):
            layer.append(make_bottleneck(pg, inplanes, planes, 1, False))
        layers.append(layer)
    params["layers"] = layers

    dec_channels = [(2048, 1024), (1024, 512), (512, 256), (256, 128), (128, 64)]
    # stored as (kh, kw, cin, cout) with transposed-conv tap semantics
    # (a real PyTorch checkpoint (cin,cout,kh,kw) would need transposing).
    params["decoder"] = [{"w": pg.conv(4, 4, cin, cout), "b": pg.bias(cout)}
                         for cin, cout in dec_channels]
    params["attention"] = [{"w": pg.conv(1, 1, cout, 1).reshape(1, cout),
                            "b": pg.bias(1)}
                           for _, cout in dec_channels]
    params["depth_w"] = pg.conv(3, 3, 64, 1); params["depth_b"] = pg.bias(1)
    params["unc_w"] = pg.conv(3, 3, 64, 1); params["unc_b"] = pg.bias(1)
    params["norm_w"] = pg.conv(3, 3, 64, 3); params["norm_b"] = pg.bias(3)
    return params


# ---- prep: reshape / bf16-cast / pad weights once, build fused structures ----
def _prep_conv_weight(w):
    kh, kw, cin, cout = w.shape
    K = kh * kw * cin
    tk = _pick_tile_k(K)
    Kp = _round_up(K, tk)
    tn = _pick_tile_mn(cout, _TN_CAP)
    Np = _round_up(cout, tn)
    w2 = jnp.pad(w.reshape(K, cout).astype(jnp.bfloat16), ((0, Kp - K), (0, Np - cout)))
    return {"w": w2, "kh": kh, "kw": kw, "cout": cout, "tk": tk, "tn": tn}


def _prep_deconv_stage(wt, b_dec, att_w, att_b):
    # sub-pixel decomposition: out[2r+a, 2c+b] uses taps rows/cols below.
    _, _, cin, cout = wt.shape
    K = 4 * cin
    tk = _pick_tile_k(K)
    Kp = _round_up(K, tk)
    Np = _round_up(cout, 128)                              # single N tile for the gate
    rows = ((3, 1), (2, 0))
    cols = ((3, 1), (2, 0))
    phases = []
    for a in (0, 1):
        for b in (0, 1):
            wab = wt[jnp.array(rows[a])][:, jnp.array(cols[b])]      # (2,2,cin,cout)
            w2 = jnp.pad(wab.reshape(K, cout).astype(jnp.bfloat16),
                         ((0, Kp - K), (0, Np - cout)))
            phases.append(w2)
    return {"w_phases": jnp.stack(phases),                 # (4, Kp, Np) bf16
            "b_dec": jnp.pad(b_dec, ((0, 0), (0, Np - cout))),
            "att_w": jnp.pad(att_w, ((0, 0), (0, Np - cout))),
            "att_b": att_b,
            "cout": cout, "tk": tk}


def prepare_params(raw):
    p = {"conv1": _prep_conv_weight(raw["conv1"]), "bn1": raw["bn1"]}
    layers = []
    for layer in raw["layers"]:
        blocks = []
        for blk in layer:
            nb = {"stride": blk["stride"],
                  "conv1": _prep_conv_weight(blk["conv1"]), "bn1": blk["bn1"],
                  "conv2": _prep_conv_weight(blk["conv2"]), "bn2": blk["bn2"],
                  "conv3": _prep_conv_weight(blk["conv3"]), "bn3": blk["bn3"]}
            if "down_conv" in blk:
                nb["down_conv"] = _prep_conv_weight(blk["down_conv"])
                nb["down_bn"] = blk["down_bn"]
            blocks.append(nb)
        layers.append(blocks)
    p["layers"] = layers
    p["dec_stages"] = [_prep_deconv_stage(d["w"], d["b"], a["w"], a["b"])
                       for d, a in zip(raw["decoder"], raw["attention"])]
    # fused heads: single (3,3,64,5) conv, bias vector padded to 128 lanes
    w_heads = jnp.concatenate([raw["depth_w"], raw["unc_w"], raw["norm_w"]], axis=-1)
    b_heads = jnp.concatenate([raw["depth_b"], raw["unc_b"], raw["norm_b"]], axis=-1)
    K = 3 * 3 * 64
    tk = _pick_tile_k(K)
    Kp = _round_up(K, tk)
    p["heads_w"] = jnp.pad(w_heads.reshape(K, 5).astype(jnp.bfloat16),
                           ((0, Kp - K), (0, 128 - 5)))
    p["heads_b"] = jnp.pad(b_heads, ((0, 0), (0, 128 - 5)))
    p["heads_tk"] = tk
    return p


# --------------------------------- forward -----------------------------------
def bottleneck_forward(x, p):
    identity = x
    out = conv2d(x, p["conv1"])
    out = batchnorm(out, p["bn1"], relu=True)
    out = conv2d(out, p["conv2"], stride=p["stride"], padding=1)
    out = batchnorm(out, p["bn2"], relu=True)
    out = conv2d(out, p["conv3"])
    if "down_conv" in p:
        identity = conv2d(x, p["down_conv"], stride=p["stride"])
        identity = batchnorm(identity, p["down_bn"], relu=False)
    return batchnorm(out, p["bn3"], residual=identity)     # relu(bn3(out) + identity)


def forward(x_nchw, params):
    x = jnp.transpose(x_nchw, (0, 2, 3, 1)).astype(jnp.float32)   # NCHW -> NHWC

    # --- ResNet-50 backbone (children()[:-2]), training-mode (batch-stat) BN ---
    x = conv2d(x, params["conv1"], stride=2, padding=3)
    x = batchnorm(x, params["bn1"], relu=True)
    x = _maxpool_3x3_s2_p1(x)
    for layer in params["layers"]:
        for blk in layer:
            x = bottleneck_forward(x, blk)

    # --- decoder: ConvTranspose2d(4,2,1) + bias + attention, fused epilogue ---
    for st in params["dec_stages"]:
        x = _deconv_attn_stage(x, st["w_phases"], st["b_dec"], st["att_w"],
                               st["att_b"], cout=st["cout"], tk=st["tk"])

    # --- fused heads: depth, exp-uncertainty, L2-normalized normals ---
    return _heads_forward(x, params["heads_w"], params["heads_b"],
                          tk=params["heads_tk"])


# ----------------------------------- main -------------------------------------
if __name__ == "__main__":
    key = jax.random.PRNGKey(0)
    # input spatial size must be divisible by 32 (backbone /32, decoder x32)
    x = jax.random.normal(key, (2, 3, 32, 32), jnp.float32)       # NCHW like PyTorch
    params = prepare_params(make_params(seed=0))

    depth, uncertainty, normals = forward(x, params)
    jax.block_until_ready((depth, uncertainty, normals))

    assert depth.shape == (2, 1, 32, 32)
    assert uncertainty.shape == (2, 1, 32, 32)
    assert normals.shape == (2, 3, 32, 32)
    assert bool(jnp.all(uncertainty > 0.0))
    print("KERNEL_OK")
</pallas_src>

<mosaic_0001>
module attributes {stable_mosaic.version = 11 : i64} {
  func.func @_matmul_kernel(%arg0: i32, %arg1: i32, %arg2: i32, %arg3: memref<256x256xbf16, #tpu.memory_space<vmem>>, %arg4: memref<256x128xbf16, #tpu.memory_space<vmem>>, %arg5: memref<256x128xf32, #tpu.memory_space<vmem>>, %arg6: memref<256x128xf32, #tpu.memory_space<vmem>>) attributes {dimension_semantics = [#tpu.dimension_semantics<parallel>, #tpu.dimension_semantics<parallel>, #tpu.dimension_semantics<arbitrary>], iteration_bounds = array<i64: 2, 1, 1>, scalar_prefetch = 0 : i64, scratch_operands = 1 : i64, tpu.core_type = #tpu.core_type<tc>, window_params = [{transform_indices = @transform_0, window_bounds = array<i64: 256, 256>}, {transform_indices = @transform_1, window_bounds = array<i64: 256, 128>}, {transform_indices = @transform_2, window_bounds = array<i64: 256, 128>}]} {
    %c0_i32 = arith.constant 0 : i32
    %0 = arith.cmpi eq, %arg2, %c0_i32 : i32
    %1 = arith.extui %0 : i1 to i32
    %c0_i32_0 = arith.constant 0 : i32
    %2 = arith.cmpi ne, %1, %c0_i32_0 : i32
    scf.if %2 {
      %cst_10 = arith.constant 0.000000e+00 : f32
      %12 = vector.broadcast %cst_10 : f32 to vector<256x128xf32>
      %c0_11 = arith.constant 0 : index
      %c0_12 = arith.constant 0 : index
      %13 = vector.load %arg6[%c0_11, %c0_12] : memref<256x128xf32, #tpu.memory_space<vmem>>, vector<256x128xf32>
      tpu.vector_store %arg6[%c0_11, %c0_12], %12 {strides = array<i32>} : memref<256x128xf32, #tpu.memory_space<vmem>>, vector<256x128xf32>,
    } else {
    }
    %c0 = arith.constant 0 : index
    %c0_1 = arith.constant 0 : index
    %3 = vector.load %arg6[%c0, %c0_1] : memref<256x128xf32, #tpu.memory_space<vmem>>, vector<256x128xf32>
    %c0_2 = arith.constant 0 : index
    %c0_3 = arith.constant 0 : index
    %4 = vector.load %arg3[%c0_2, %c0_3] : memref<256x256xbf16, #tpu.memory_space<vmem>>, vector<256x256xbf16>
    %c0_4 = arith.constant 0 : index
    %c0_5 = arith.constant 0 : index
    %5 = vector.load %arg4[%c0_4, %c0_5] : memref<256x128xbf16, #tpu.memory_space<vmem>>, vector<256x128xbf16>
    %cst = arith.constant dense<0.000000e+00> : vector<256x128xf32>
    %6 = tpu.matmul %4, %5, %cst {dimension_numbers = #tpu.dot_dimension_numbers<[1], [0], [0], [1], [0, 0, 1, 1], [], []>} : vector<256x256xbf16>, vector<256x128xbf16>, vector<256x128xf32> -> vector<256x128xf32>
    %7 = arith.addf %3, %6 : vector<256x128xf32>
    %c0_6 = arith.constant 0 : index
    %c0_7 = arith.constant 0 : index
    %8 = vector.load %arg6[%c0_6, %c0_7] : memref<256x128xf32, #tpu.memory_space<vmem>>, vector<256x128xf32>
    tpu.vector_store %arg6[%c0_6, %c0_7], %7 {strides = array<i32>} : memref<256x128xf32, #tpu.memory_space<vmem>>, vector<256x128xf32>,
    %c0_i32_8 = arith.constant 0 : i32
    %9 = arith.cmpi eq, %arg2, %c0_i32_8 : i32
    %10 = arith.extui %9 : i1 to i32
    %c0_i32_9 = arith.constant 0 : i32
    %11 = arith.cmpi ne, %10, %c0_i32_9 : i32
    scf.if %11 {
      %c0_10 = arith.constant 0 : index
      %c0_11 = arith.constant 0 : index
      %12 = vector.load %arg6[%c0_10, %c0_11] : memref<256x128xf32, #tpu.memory_space<vmem>>, vector<256x128xf32>
      %c0_12 = arith.constant 0 : index
      %c0_13 = arith.constant 0 : index
      %13 = vector.load %arg5[%c0_12, %c0_13] : memref<256x128xf32, #tpu.memory_space<vmem>>, vector<256x128xf32>
      tpu.vector_store %arg5[%c0_12, %c0_13], %12 {strides = array<i32>} : memref<256x128xf32, #tpu.memory_space<vmem>>, vector<256x128xf32>,
    } else {
    }
    return
  }
  func.func @transform_0(%arg0: i32, %arg1: i32, %arg2: i32) -> (i32, i32) {
    %c0_i32 = arith.constant 0 : i32
    return %arg0, %arg2 : i32, i32
  }
  func.func @transform_1(%arg0: i32, %arg1: i32, %arg2: i32) -> (i32, i32) {
    %c0_i32 = arith.constant 0 : i32
    return %arg2, %arg1 : i32, i32
  }
  func.func @transform_2(%arg0: i32, %arg1: i32, %arg2: i32) -> (i32, i32) {
    %c0_i32 = arith.constant 0 : i32
    return %arg0, %arg1 : i32, i32
  }
}

</mosaic_0001>

<bundles_post_ra>
// kernel: _conv2d_jit.1
= control target key start
LH: loop header
LB: loop body
LE: loop exit
PB: predicated region body
PF: predicated region fallthrough
CT: control target
= control target key end

     0   :  { %7 = vsyncpa [#allocation4], 0  ;;  %s1660_s0 = inlined_call_operand.vmem [shape: bf16[512,256], index: 0, kind: input, shape index: {}]   ;;  %s1661_s1 = inlined_call_operand.vmem [shape: bf16[256,128], index: 1, kind: input, shape index: {}]   ;;  %s1662_s2 = inlined_call_operand.hbm [shape: f32[512,128], index: 2, kind: output, shape index: {}]  }
   0x1   :  { %9 = vsyncpa [#allocation4 + $0x1], 0  ;;  %s1425_s9 = smov 0   ;;  %s1427_s10 = smov 0  }
   0x2   :  { %s1429_s11 = smov 0   ;;  %s1431_s12 = smov 0  }
   0x3   :  { %s1433_s13 = smov 0   ;;  %s1435_s14 = smov 0  }
   0x4 LB: > { %s1013_s15 = sadd.s32 4294967295, %s1405_s14   ;;  %s1014_s16 = sadd.s32 4294967294, %s1405_s14   ;;  %s1405_s14 = sphi %s1435_s14, %s15_s14   ;;  %s1401_s13 = sphi %s1433_s13, %s1669_s13   ;;  %s1397_s12 = sphi %s1431_s12, %s1668_s12   ;;  %s1393_s11 = sphi %s1429_s11, %s1667_s11   ;;  %s1389_s10 = sphi %s1427_s10, %s1666_s10   ;;  %s1385_s9 = sphi %s1425_s9, %s1665_s9  }
   0x5   : > { %s34_s17 = sadd.s32 1, %s1401_s13  ;;  %s99_s18 = sadd.s32 1, %s1393_s11 }
   0x6   : > { %p36_p0 = scmp.ge.s32.totalorder %s34_s17, 2  ;;  %p109_p1 = scmp.ne.s32.totalorder %s1393_s11, %s1389_s10 }
   0x7   : > { %p110_p2 = scmp.eq.s32.totalorder %s1013_s15, 1  ;;  %p115_p3 = scmp.ne.s32.totalorder %s1389_s10, %s1385_s9 }
   0x8   : > { %s1671_s17 = smov (%p36_p0, %s34_s17), 0  ;;  %p116_p5 = scmp.eq.s32.totalorder %s1014_s16, 1 }
   0x9   : > { %p1465_p4 = por %p110_p2, %p109_p1  ;;  %s94_s20 = ssub.s32 %s1401_s13, %s1671_s17 }
   0xa   : > { %p1018_p6 = scmp.ge.s32.totalorder %s1405_s14, 1  ;;  %p97_p7 = scmp.eq.s32.totalorder %s94_s20, 0 }
   0xb   : > { %p1472_p8 = por %p116_p5, %p115_p3  ;;  %p161_p9 = scmp.lt.s32.totalorder %s1405_s14, 3 }
   0xc   : > { %s1478_s22 = scalar_select %p97_p7, %s1393_s11, %s99_s18  }
   0xd   : > { %p162_p10 = pnand %p1018_p6, %p161_p9 }
   0xe   : > { %v1263_v0 = vld [vmem:[%s1661_s1 + $0x40] sm:$0xff] (!%p162_p10)   ;;  %s1020_s25 = sshll.u32 (!%p162_p10), %s1397_s12, 5  ;;  %v1265_v2 = vld [vmem:[%s1661_s1 + $0x48] sm:$0xff] (!%p162_p10)   ;;  %v1267_v4 = vld [vmem:[%s1661_s1 + $0x50] sm:$0xff] (!%p162_p10)   ;;  %s193_s24 = sand.u32 (!%p162_p10), 1, %s1389_s10  }
   0xf   : > { %165 = sbr.rel (%p162_p10) target bundleno = 335 (0x14f), region = 28  ;;  %v1264_v1 = vld [vmem:[%s1661_s1] sm:$0xff] (!%p162_p10)   ;;  %1078 = vmatprep.subr.bf16.mxu0 (!%p162_p10), %v1263_v0  ;;  %1190 = vmatprep.subr.bf16.mxu1 (!%p162_p10), %v1263_v0  ;;  %v1266_v3 = vld [vmem:[%s1661_s1 + $0x8] sm:$0xff] (!%p162_p10)   ;;  %p198_p11 = scmp.lt.s32.totalorder (!%p162_p10), %s1020_s25, 63  ;;  %v1268_v5 = vld [vmem:[%s1661_s1 + $0x10] sm:$0xff] (!%p162_p10)  }
  0x10   : > { %1079 = vmatpush3.bf16.msra.mxu0 (!%p162_p10), %v1264_v1  ;;  %1198 = vmatpush3.bf16.msra.mxu1 (!%p162_p10), %v1264_v1  ;;  %v1269_v6 = vld [vmem:[%s1661_s1 + $0x58] sm:$0xff] (!%p162_p10)   ;;  %v1271_v8 = vld [vmem:[%s1661_s1 + $0x60] sm:$0xff] (!%p162_p10)   ;;  %v1273_v10 = vld [vmem:[%s1661_s1 + $0x68] sm:$0xff] (!%p162_p10)   ;;  %s1019_s26 = sshll.u32 (!%p162_p10), %s193_s24, 8  ;;  %s1407_s5 = smov (!%p162_p10), [#allocation3]  }
  0x11   : > { %1080 = vmatprep.subr.bf16.mxu0 (!%p162_p10), %v1265_v2  ;;  %1191 = vmatprep.subr.bf16.mxu1 (!%p162_p10), %v1265_v2  ;;  %v1270_v7 = vld [vmem:[%s1661_s1 + $0x18] sm:$0xff] (!%p162_p10)   ;;  %v1272_v9 = vld [vmem:[%s1661_s1 + $0x20] sm:$0xff] (!%p162_p10)   ;;  %v1274_v13 = vld [vmem:[%s1661_s1 + $0x28] sm:$0xff] (!%p162_p10)   ;;  %s1569_s27 = scalar_lea.vmem (!%p162_p10), [#allocation3], %s1019_s26  ;;  %s1331_s6 = sshll.u32 (!%p162_p10), %s1407_s5, 4  ;;  %s1332_s6 = int_to_ptr.vmem [resolvable:$false] %s1331_s6 }
  0x12   : > { %v1275_v14 = vld [vmem:[%s1661_s1 + $0x70] sm:$0xff] (!%p162_p10)   ;;  %v1277_v16 = vld [vmem:[%s1661_s1 + $0x78] sm:$0xff] (!%p162_p10)   ;;  %s914_s29 = sshll.u32 (!%p162_p10), %s1569_s27, 4  ;;  %s1333_s7 = scalar_lea.vmem (!%p162_p10), %s1332_s6, 8192  ;;  %s1606_s29 = int_to_ptr.vmem [resolvable:$true] %s914_s29 }
  0x13   : > { %v1276_v15 = vld [vmem:[%s1661_s1 + $0x30] sm:$0xff] (!%p162_p10)   ;;  %v1278_v17 = vld [vmem:[%s1661_s1 + $0x38] sm:$0xff] (!%p162_p10)   ;;  %s1327_s4 = scalar_lea.vmem (!%p162_p10), %s1606_s29, 4096  ;;  %p1334_p1 = scmp.lt.s32.totalorder (!%p162_p10), %s1606_s29, %s1332_s6 }
  0x14   : > { %1081 = vmatpush3.bf16.msra.mxu0 (!%p162_p10), %v1266_v3  ;;  %1199 = vmatpush3.bf16.msra.mxu1 (!%p162_p10), %v1266_v3  ;;  %p1328_p12 = scmp.ne.s32.totalorder (!%p162_p10), %s1606_s29, %s1327_s4  ;;  %p1335_p2 = scmp.lt.s32.totalorder (!%p162_p10), %s1333_s7, %s1327_s4 }
  0x15   : > { %1082 = vmatprep.subr.bf16.mxu0 (!%p162_p10), %v1267_v4  ;;  %1192 = vmatprep.subr.bf16.mxu1 (!%p162_p10), %v1267_v4 }
  0x16   : > { %s1673_s25 = smov (!%p198_p11, %s1020_s25), 63  ;;  %p1329_p13 = pnand %p1328_p12, %p1465_p4 }
  0x17   : > { %s1076_s20 = sshll.u32 %s1673_s25, 3  ;;  %p1336_p3 = por %p1335_p2, %p1334_p1 }
  0x18   : > { %1083 = vmatpush3.bf16.msra.mxu0 %v1268_v5  ;;  %1200 = vmatpush3.bf16.msra.mxu1 %v1268_v5  ;;  %s1511_s28 = scalar_lea.vmem %s1660_s0, %s1076_s20  ;;  %p1330_p0 = pneg %p1329_p13 }
  0x19   : > { %1084 = vmatprep.subr.bf16.mxu0 %v1269_v6  ;;  %1193 = vmatprep.subr.bf16.mxu1 %v1269_v6  ;;  %v1281_v11 = vld [vmem:[%s1511_s28 + $0x4] ss:$8 sps:$4 sm:$0xff]   ;;  %v1279_v18 = vld [vmem:[%s1511_s28] ss:$8 sps:$4 sm:$0xff]   ;;  %v1285_v20 = vld [vmem:[%s1511_s28 + $0x14] ss:$8 sps:$4 sm:$0xff]  }
  0x1a   : > { %v1284_v12 = vld [vmem:[%s1511_s28 + $0x84] ss:$8 sps:$4 sm:$0xff]   ;;  %639 = vmatprep.mubr.bf16.mxu0 %v1281_v11  ;;  %v1282_v19 = vld [vmem:[%s1511_s28 + $0x80] ss:$8 sps:$4 sm:$0xff]   ;;  %v1287_v21 = vld [vmem:[%s1511_s28 + $0x94] ss:$8 sps:$4 sm:$0xff]   ;;  %p1337_p5 = pnand %p1336_p3, %p1330_p0 }
  0x1b   : > { %703 = vmatprep.mubr.bf16.mxu1 %v1284_v12  ;;  %v1289_v22 = vld [vmem:[%s1511_s28 + $0x10] ss:$8 sps:$4 sm:$0xff]   ;;  %v1291_v24 = vld [vmem:[%s1511_s28 + $0x24] ss:$8 sps:$4 sm:$0xff]   ;;  %v1295_v26 = vld [vmem:[%s1511_s28 + $0x20] ss:$8 sps:$4 sm:$0xff]  }
  0x1c   : > { %1085 = vmatpush3.bf16.msra.mxu0 %v1270_v7  ;;  %1201 = vmatpush3.bf16.msra.mxu1 %v1270_v7  ;;  %v1290_v23 = vld [vmem:[%s1511_s28 + $0x90] ss:$8 sps:$4 sm:$0xff]   ;;  %v1293_v25 = vld [vmem:[%s1511_s28 + $0xa4] ss:$8 sps:$4 sm:$0xff]   ;;  %v1296_v27 = vld [vmem:[%s1511_s28 + $0xa0] ss:$8 sps:$4 sm:$0xff]  }
  0x1d   : > { %1086 = vmatprep.subr.bf16.mxu0 %v1271_v8  ;;  %1194 = vmatprep.subr.bf16.mxu1 %v1271_v8  ;;  %v1297_v28 = vld [vmem:[%s1511_s28 + $0x34] ss:$8 sps:$4 sm:$0xff]   ;;  %v1301_v30 = vld [vmem:[%s1511_s28 + $0x30] ss:$8 sps:$4 sm:$0xff]   ;;  %v1303_v32 = vld [vmem:[%s1511_s28 + $0x44] ss:$8 sps:$4 sm:$0xff]  }
  0x1e   : > { %v1299_v29 = vld [vmem:[%s1511_s28 + $0xb4] ss:$8 sps:$4 sm:$0xff]   ;;  %v1302_v31 = vld [vmem:[%s1511_s28 + $0xb0] ss:$8 sps:$4 sm:$0xff]   ;;  %v1305_v33 = vld [vmem:[%s1511_s28 + $0xc4] ss:$8 sps:$4 sm:$0xff]  }
  0x1f   : > { %v1307_v34 = vld [vmem:[%s1511_s28 + $0x40] ss:$8 sps:$4 sm:$0xff]   ;;  %v1309_v36 = vld [vmem:[%s1511_s28 + $0x54] ss:$8 sps:$4 sm:$0xff]   ;;  %v1313_v38 = vld [vmem:[%s1511_s28 + $0x50] ss:$8 sps:$4 sm:$0xff]  }
  0x20   : > { %1087 = vmatpush3.bf16.msra.mxu0 %v1272_v9  ;;  %1202 = vmatpush3.bf16.msra.mxu1 %v1272_v9  ;;  %v1308_v35 = vld [vmem:[%s1511_s28 + $0xc0] ss:$8 sps:$4 sm:$0xff]   ;;  %v1311_v37 = vld [vmem:[%s1511_s28 + $0xd4] ss:$8 sps:$4 sm:$0xff]   ;;  %v1314_v39 = vld [vmem:[%s1511_s28 + $0xd0] ss:$8 sps:$4 sm:$0xff]  }
  0x21   : > { %1088 = vmatprep.subr.bf16.mxu0 %v1273_v10  ;;  %1195 = vmatprep.subr.bf16.mxu1 %v1273_v10  ;;  %v1315_v40 = vld [vmem:[%s1511_s28 + $0x64] ss:$8 sps:$4 sm:$0xff]   ;;  %v1319_v42 = vld [vmem:[%s1511_s28 + $0x60] ss:$8 sps:$4 sm:$0xff]   ;;  %v1321_v44 = vld [vmem:[%s1511_s28 + $0x74] ss:$8 sps:$4 sm:$0xff]  }
  0x22   : > { %v1317_v41 = vld [vmem:[%s1511_s28 + $0xe4] ss:$8 sps:$4 sm:$0xff]   ;;  %v1320_v43 = vld [vmem:[%s1511_s28 + $0xe0] ss:$8 sps:$4 sm:$0xff]   ;;  %v1323_v45 = vld [vmem:[%s1511_s28 + $0xf4] ss:$8 sps:$4 sm:$0xff]  }
  0x23   : > { %v1325_v46 = vld [vmem:[%s1511_s28 + $0x70] ss:$8 sps:$4 sm:$0xff]  }
  0x24   : > { %1089 = vmatpush3.bf16.msra.mxu0 %v1274_v13  ;;  %1203 = vmatpush3.bf16.msra.mxu1 %v1274_v13  ;;  %v1326_v47 = vld [vmem:[%s1511_s28 + $0xf0] ss:$8 sps:$4 sm:$0xff]   ;;  %s1077_s28 = sshll.u32 %s1397_s12, 12  ;;  %s1614_s12 = scalar_lea.sflag [#allocation4], %s193_s24 }
  0x25   : > { %1090 = vmatprep.subr.bf16.mxu0 %v1275_v14  ;;  %1196 = vmatprep.subr.bf16.mxu1 %v1275_v14  ;;  %s1604_s3 = scalar_lea.hbm %s1662_s2, %s1077_s28 }
  0x28   : > { %1091 = vmatpush3.bf16.msra.mxu0 %v1276_v15  ;;  %1204 = vmatpush3.bf16.msra.mxu1 %v1276_v15 }
  0x29   : > { %1092 = vmatprep.subr.bf16.mxu0 %v1277_v16  ;;  %1197 = vmatprep.subr.bf16.mxu1 %v1277_v16 }
  0x2c   : > { %1093 = vmatpush3.bf16.msra.mxu0 %v1278_v17  ;;  %1205 = vmatpush3.bf16.msra.mxu1 %v1278_v17 }
  0x2f   : > { %640 = vmatmul.mubr.bf16.vlgmr.msra.gmra.mrb[0].mxu0 %v1279_v18  ;;  %704 = vmatmul.mubr.bf16.vlgmr.msra.gmra.mrb[0].mxu1 %v1282_v19 }
  0x30   : > { %647 = vmatprep.mubr.bf16.mxu0 %v1285_v20  ;;  %711 = vmatprep.mubr.bf16.mxu1 %v1287_v21 }
  0x37   : > { %648 = vmatmul.mubr.bf16.gmra.mrb[4].mxu0 %v1289_v22  ;;  %712 = vmatmul.mubr.bf16.gmra.mrb[4].mxu1 %v1290_v23 }
  0x38   : > { %655 = vmatprep.mubr.bf16.mxu0 %v1291_v24  ;;  %719 = vmatprep.mubr.bf16.mxu1 %v1293_v25 }
  0x3f   : > { %656 = vmatmul.mubr.bf16.gmra.mrb[8].mxu0 %v1295_v26  ;;  %720 = vmatmul.mubr.bf16.gmra.mrb[8].mxu1 %v1296_v27 }
  0x40   : > { %663 = vmatprep.mubr.bf16.mxu0 %v1297_v28  ;;  %727 = vmatprep.mubr.bf16.mxu1 %v1299_v29 }
  0x47   : > { %664 = vmatmul.mubr.bf16.gmra.mrb[12].mxu0 %v1301_v30  ;;  %728 = vmatmul.mubr.bf16.gmra.mrb[12].mxu1 %v1302_v31 }
  0x48   : > { %671 = vmatprep.mubr.bf16.mxu0 %v1303_v32  ;;  %735 = vmatprep.mubr.bf16.mxu1 %v1305_v33 }
  0x4f   : > { %672 = vmatmul.mubr.bf16.gmra.mrb[16].mxu0 %v1307_v34  ;;  %736 = vmatmul.mubr.bf16.gmra.mrb[16].mxu1 %v1308_v35 }
  0x50   : > { %679 = vmatprep.mubr.bf16.mxu0 %v1309_v36  ;;  %743 = vmatprep.mubr.bf16.mxu1 %v1311_v37 }
  0x57   : > { %680 = vmatmul.mubr.bf16.gmra.mrb[20].mxu0 %v1313_v38  ;;  %744 = vmatmul.mubr.bf16.gmra.mrb[20].mxu1 %v1314_v39 }
  0x58   : > { %687 = vmatprep.mubr.bf16.mxu0 %v1315_v40  ;;  %751 = vmatprep.mubr.bf16.mxu1 %v1317_v41 }
  0x5f   : > { %688 = vmatmul.mubr.bf16.gmra.mrb[24].mxu0 %v1319_v42  ;;  %752 = vmatmul.mubr.bf16.gmra.mrb[24].mxu1 %v1320_v43 }
  0x60   : > { %695 = vmatprep.mubr.bf16.mxu0 %v1321_v44  ;;  %759 = vmatprep.mubr.bf16.mxu1 %v1323_v45 }
  0x67   : > { %696 = vmatmul.mubr.bf16.gmra.mrb[28].mxu0 %v1325_v46  ;;  %760 = vmatmul.mubr.bf16.gmra.mrb[28].mxu1 %v1326_v47 }
 0x102   : > { %v1094_v48 = vpop.f32.mrb[0].mxu0  ;;  %v1142_v49 = vpop.f32.mrb[0].mxu1 }
 0x103   : > { %v1095_v50 = vpop.f32.mrb[1].mxu0  ;;  %v1143_v51 = vpop.f32.mrb[1].mxu1 }
 0x104   : > { %v1096_v52 = vadd.f32 %v1095_v50, %v1094_v48  ;;  %v1144_v53 = vadd.f32 %v1143_v51, %v1142_v49  ;;  %v1097_v54 = vpop.f32.mrb[2].mxu0  ;;  %v1145_v55 = vpop.f32.mrb[2].mxu1 }
 0x105   : > { %v1098_v56 = vpop.f32.mrb[3].mxu0  ;;  %v1146_v57 = vpop.f32.mrb[3].mxu1 }
 0x106   : > { %867 = vst [vmem:[%s1569_s27] sm:$0xff] %v1096_v52  ;;  %883 = vst [vmem:[%s1569_s27 + $0x80] sm:$0xff] %v1144_v53  ;;  %v1099_v58 = vadd.f32 %v1098_v56, %v1097_v54  ;;  %v1147_v59 = vadd.f32 %v1146_v57, %v1145_v55 }
 0x108   : > { %868 = vst [vmem:[%s1569_s27 + $0x8] sm:$0xff] %v1099_v58  ;;  %884 = vst [vmem:[%s1569_s27 + $0x88] sm:$0xff] %v1147_v59 }
 0x10a   : > { %v1100_v60 = vpop.f32.mrb[4].mxu0  ;;  %v1148_v61 = vpop.f32.mrb[4].mxu1 }
 0x10b   : > { %v1101_v62 = vpop.f32.mrb[5].mxu0  ;;  %v1149_v63 = vpop.f32.mrb[5].mxu1 }
 0x10c   : > { %v1102_v0 = vadd.f32 %v1101_v62, %v1100_v60  ;;  %v1150_v1 = vadd.f32 %v1149_v63, %v1148_v61  ;;  %v1103_v2 = vpop.f32.mrb[6].mxu0  ;;  %v1151_v3 = vpop.f32.mrb[6].mxu1 }
 0x10d   : > { %v1104_v4 = vpop.f32.mrb[7].mxu0  ;;  %v1152_v5 = vpop.f32.mrb[7].mxu1 }
 0x10e   : > { %869 = vst [vmem:[%s1569_s27 + $0x10] sm:$0xff] %v1102_v0  ;;  %885 = vst [vmem:[%s1569_s27 + $0x90] sm:$0xff] %v1150_v1  ;;  %v1105_v6 = vadd.f32 %v1104_v4, %v1103_v2  ;;  %v1153_v7 = vadd.f32 %v1152_v5, %v1151_v3 }
 0x110   : > { %870 = vst [vmem:[%s1569_s27 + $0x18] sm:$0xff] %v1105_v6  ;;  %886 = vst [vmem:[%s1569_s27 + $0x98] sm:$0xff] %v1153_v7 }
 0x112   : > { %v1106_v8 = vpop.f32.mrb[8].mxu0  ;;  %v1154_v9 = vpop.f32.mrb[8].mxu1 }
 0x113   : > { %v1107_v10 = vpop.f32.mrb[9].mxu0  ;;  %v1155_v11 = vpop.f32.mrb[9].mxu1 }
 0x114   : > { %v1108_v12 = vadd.f32 %v1107_v10, %v1106_v8  ;;  %v1156_v13 = vadd.f32 %v1155_v11, %v1154_v9  ;;  %v1109_v14 = vpop.f32.mrb[10].mxu0  ;;  %v1157_v15 = vpop.f32.mrb[10].mxu1 }
 0x115   : > { %v1110_v16 = vpop.f32.mrb[11].mxu0  ;;  %v1158_v17 = vpop.f32.mrb[11].mxu1 }
 0x116   : > { %871 = vst [vmem:[%s1569_s27 + $0x20] sm:$0xff] %v1108_v12  ;;  %887 = vst [vmem:[%s1569_s27 + $0xa0] sm:$0xff] %v1156_v13  ;;  %v1111_v18 = vadd.f32 %v1110_v16, %v1109_v14  ;;  %v1159_v19 = vadd.f32 %v1158_v17, %v1157_v15 }
 0x118   : > { %872 = vst [vmem:[%s1569_s27 + $0x28] sm:$0xff] %v1111_v18  ;;  %888 = vst [vmem:[%s1569_s27 + $0xa8] sm:$0xff] %v1159_v19 }
 0x11a   : > { %v1112_v20 = vpop.f32.mrb[12].mxu0  ;;  %v1160_v21 = vpop.f32.mrb[12].mxu1 }
 0x11b   : > { %v1113_v22 = vpop.f32.mrb[13].mxu0  ;;  %v1161_v23 = vpop.f32.mrb[13].mxu1 }
 0x11c   : > { %v1114_v24 = vadd.f32 %v1113_v22, %v1112_v20  ;;  %v1162_v25 = vadd.f32 %v1161_v23, %v1160_v21  ;;  %v1115_v26 = vpop.f32.mrb[14].mxu0  ;;  %v1163_v27 = vpop.f32.mrb[14].mxu1 }
 0x11d   : > { %v1116_v28 = vpop.f32.mrb[15].mxu0  ;;  %v1164_v29 = vpop.f32.mrb[15].mxu1 }
 0x11e   : > { %873 = vst [vmem:[%s1569_s27 + $0x30] sm:$0xff] %v1114_v24  ;;  %889 = vst [vmem:[%s1569_s27 + $0xb0] sm:$0xff] %v1162_v25  ;;  %v1117_v30 = vadd.f32 %v1116_v28, %v1115_v26  ;;  %v1165_v31 = vadd.f32 %v1164_v29, %v1163_v27 }
 0x120   : > { %874 = vst [vmem:[%s1569_s27 + $0x38] sm:$0xff] %v1117_v30  ;;  %890 = vst [vmem:[%s1569_s27 + $0xb8] sm:$0xff] %v1165_v31 }
 0x122   : > { %v1118_v32 = vpop.f32.mrb[16].mxu0  ;;  %v1166_v33 = vpop.f32.mrb[16].mxu1 }
 0x123   : > { %v1119_v34 = vpop.f32.mrb[17].mxu0  ;;  %v1167_v35 = vpop.f32.mrb[17].mxu1 }
 0x124   : > { %v1120_v36 = vadd.f32 %v1119_v34, %v1118_v32  ;;  %v1168_v37 = vadd.f32 %v1167_v35, %v1166_v33  ;;  %v1121_v38 = vpop.f32.mrb[18].mxu0  ;;  %v1169_v39 = vpop.f32.mrb[18].mxu1 }
 0x125   : > { %v1122_v40 = vpop.f32.mrb[19].mxu0  ;;  %v1170_v41 = vpop.f32.mrb[19].mxu1 }
 0x126   : > { %875 = vst [vmem:[%s1569_s27 + $0x40] sm:$0xff] %v1120_v36  ;;  %891 = vst [vmem:[%s1569_s27 + $0xc0] sm:$0xff] %v1168_v37  ;;  %v1123_v42 = vadd.f32 %v1122_v40, %v1121_v38  ;;  %v1171_v43 = vadd.f32 %v1170_v41, %v1169_v39 }
 0x128   : > { %876 = vst [vmem:[%s1569_s27 + $0x48] sm:$0xff] %v1123_v42  ;;  %892 = vst [vmem:[%s1569_s27 + $0xc8] sm:$0xff] %v1171_v43 }
 0x12a   : > { %v1124_v44 = vpop.f32.mrb[20].mxu0  ;;  %v1172_v45 = vpop.f32.mrb[20].mxu1 }
 0x12b   : > { %v1125_v46 = vpop.f32.mrb[21].mxu0  ;;  %v1173_v47 = vpop.f32.mrb[21].mxu1 }
 0x12c   : > { %v1126_v48 = vadd.f32 %v1125_v46, %v1124_v44  ;;  %v1174_v49 = vadd.f32 %v1173_v47, %v1172_v45  ;;  %v1127_v50 = vpop.f32.mrb[22].mxu0  ;;  %v1175_v51 = vpop.f32.mrb[22].mxu1 }
 0x12d   : > { %v1128_v52 = vpop.f32.mrb[23].mxu0  ;;  %v1176_v53 = vpop.f32.mrb[23].mxu1 }
 0x12e   : > { %877 = vst [vmem:[%s1569_s27 + $0x50] sm:$0xff] %v1126_v48  ;;  %893 = vst [vmem:[%s1569_s27 + $0xd0] sm:$0xff] %v1174_v49  ;;  %v1129_v54 = vadd.f32 %v1128_v52, %v1127_v50  ;;  %v1177_v55 = vadd.f32 %v1176_v53, %v1175_v51 }
 0x130   : > { %878 = vst [vmem:[%s1569_s27 + $0x58] sm:$0xff] %v1129_v54  ;;  %894 = vst [vmem:[%s1569_s27 + $0xd8] sm:$0xff] %v1177_v55 }
 0x132   : > { %v1130_v56 = vpop.f32.mrb[24].mxu0  ;;  %v1178_v57 = vpop.f32.mrb[24].mxu1 }
 0x133   : > { %v1131_v58 = vpop.f32.mrb[25].mxu0  ;;  %v1179_v59 = vpop.f32.mrb[25].mxu1 }
 0x134   : > { %v1132_v60 = vadd.f32 %v1131_v58, %v1130_v56  ;;  %v1180_v61 = vadd.f32 %v1179_v59, %v1178_v57  ;;  %v1133_v62 = vpop.f32.mrb[26].mxu0  ;;  %v1181_v63 = vpop.f32.mrb[26].mxu1 }
 0x135   : > { %v1134_v0 = vpop.f32.mrb[27].mxu0  ;;  %v1182_v1 = vpop.f32.mrb[27].mxu1 }
 0x136   : > { %879 = vst [vmem:[%s1569_s27 + $0x60] sm:$0xff] %v1132_v60  ;;  %895 = vst [vmem:[%s1569_s27 + $0xe0] sm:$0xff] %v1180_v61  ;;  %v1135_v2 = vadd.f32 %v1134_v0, %v1133_v62  ;;  %v1183_v3 = vadd.f32 %v1182_v1, %v1181_v63 }
 0x138   : > { %880 = vst [vmem:[%s1569_s27 + $0x68] sm:$0xff] %v1135_v2  ;;  %896 = vst [vmem:[%s1569_s27 + $0xe8] sm:$0xff] %v1183_v3 }
 0x13a   : > { %v1136_v4 = vpop.f32.mrb[28].mxu0  ;;  %v1184_v5 = vpop.f32.mrb[28].mxu1 }
 0x13b   : > { %v1137_v6 = vpop.f32.mrb[29].mxu0  ;;  %v1185_v7 = vpop.f32.mrb[29].mxu1 }
 0x13c   : > { %v1138_v8 = vadd.f32 %v1137_v6, %v1136_v4  ;;  %v1186_v9 = vadd.f32 %v1185_v7, %v1184_v5  ;;  %v1139_v10 = vpop.f32.mrb[30].mxu0  ;;  %v1187_v11 = vpop.f32.mrb[30].mxu1 }
 0x13d   : > { %v1140_v12 = vpop.f32.mrb[31].mxu0  ;;  %v1188_v13 = vpop.f32.mrb[31].mxu1 }
 0x13e   : > { %881 = vst [vmem:[%s1569_s27 + $0x70] sm:$0xff] %v1138_v8  ;;  %897 = vst [vmem:[%s1569_s27 + $0xf0] sm:$0xff] %v1186_v9  ;;  %v1141_v14 = vadd.f32 %v1140_v12, %v1139_v10  ;;  %v1189_v15 = vadd.f32 %v1188_v13, %v1187_v11 }
 0x140   : > { %882 = vst [vmem:[%s1569_s27 + $0x78] sm:$0xff] %v1141_v14  ;;  %898 = vst [vmem:[%s1569_s27 + $0xf8] sm:$0xff] %v1189_v15 }
 0x141   : > { %1340 = shalt.err (!%p1337_p5)
}
 0x142   : > { %s1341_s8 = scalar_lea.hbm %s1604_s3, 4096  ;;  %s1345_s18 = scalar_lea.hbm %s1662_s2, 8192 }
 0x143   : > { %p1342_p6 = scmp.ne.s32.totalorder %s1604_s3, %s1341_s8  ;;  %p1346_p10 = scmp.lt.u32.totalorder %s1604_s3, %s1662_s2 }
 0x144   : > { %p1347_p11 = scmp.lt.u32.totalorder %s1345_s18, %s1341_s8  ;;  %p1349_p13 = scmp.lt.u32.totalorder %s1341_s8, %s1604_s3 }
 0x145   : > { %p1343_p7 = pnand %p1342_p6, %p1465_p4 }
 0x146   : > { %p1348_p12 = por %p1347_p11, %p1346_p10 }
 0x147   : > { %p1344_p9 = pneg %p1343_p7 }
 0x148   : > { %p1350_p0 = por %p1349_p13, %p1348_p12 }
 0x14a   : > { %p1351_p1 = pnand %p1350_p0, %p1344_p9 }
 0x14c   : > { %1354 = shalt.err (!%p1351_p1)
}
 0x14d   : > { %s1408_s24 = smov 128   ;;  %s1409_s26 = smov 8  }
 0x14e   : > { %1206 = dma.vmem_to_hbm [thread:$0]  (%p1465_p4), %s1606_s29, 4096, %s1604_s3, %s1614_s12, %s1408_s24, %s1408_s24, %s1409_s26  }
 0x14f PF: > { %p1212_p2 = scmp.ge.s32.totalorder %s1405_s14, 2  ;;  %s929_s27 = sand.u32 1, %s1385_s9  }
 0x150   : > { %s930_s28 = scalar_lea.sflag [#allocation4], %s929_s27 }
 0x151   : > { %p1209_p3 = pnand %p1212_p2, %p1472_p8 }
 0x153   : > { %1380 = dma.done.wait (!%p1209_p3), %s930_s28, 4096  }
 0x154   : > { %1382 = vsyncadd (!%p1209_p3), %s930_s28, 4294963200  ;;  %s15_s14 = sadd.s32 1, %s1405_s14   ;;  %s1665_s9 = smov %s1389_s10 }
 0x155   : > { %p12_p5 = scmp.ge.s32.totalorder %s15_s14, 4   ;;  %s1666_s10 = smov %s1393_s11 }
 0x156   : > { %s1667_s11 = smov %s1478_s22  ;;  %s1668_s12 = smov %s1401_s13 }
 0x157   : > { %s1669_s13 = smov %s1671_s17  ;;  %14 = sbr.rel (!%p12_p5) target bundleno = 4 (0x4), region = 74 }
 0x15e   :  { %935 = vsyncpa [#allocation4], 1 }
 0x15f   :  { %937 = vsyncpa [#allocation4 + $0x1], 1 }

</bundles_post_ra>
